<compile_context>
chip_gen: v7x
topology: tpu7x:2x2x1
jax: 0.10.0
libtpu: 0.0.40
codegen_flags: <defaults>
</compile_context>

<pallas_src>
import functools

import jax
import jax.numpy as jnp
from jax.experimental import pallas as pl
from jax.experimental.pallas import tpu as pltpu


OUT_PAD = 128  # lane-dense padded width of the final layer (>= output_dim)


def _mlp_kernel(x_ref,
                w1_ref, b1_ref,
                w2_ref, b2_ref,
                w3_ref, b3_ref,
                w4_ref, b4_ref,
                o_ref):
    """Fused 4-layer MLP on one (TB, input_dim) batch tile.

    Matmul operands are bf16 (MXU-native on v5e/v6e/v7x); accumulation and all
    elementwise math (bias add, ReLU, sigmoid) stay in f32.
    """
    # x arrives as f32 (only 7 lanes wide, DMA cost negligible); cast on-chip.
    x = x_ref[...].astype(jnp.bfloat16)  # (TB, in_dim)

    # Linear(input_dim, 64) + ReLU
    h = jnp.dot(x, w1_ref[...], preferred_element_type=jnp.float32) + b1_ref[...]
    h = jnp.maximum(h, 0.0)

    # Linear(64, 128) + Sigmoid (transcendental on EUP, f32)
    h = jnp.dot(h.astype(jnp.bfloat16), w2_ref[...],
                preferred_element_type=jnp.float32) + b2_ref[...]
    h = jax.nn.sigmoid(h)

    # Linear(128, 256) + ReLU
    h = jnp.dot(h.astype(jnp.bfloat16), w3_ref[...],
                preferred_element_type=jnp.float32) + b3_ref[...]
    h = jnp.maximum(h, 0.0)

    # Linear(256, OUT_PAD)  (cols >= output_dim are zero-padded)
    h = jnp.dot(h.astype(jnp.bfloat16), w4_ref[...],
                preferred_element_type=jnp.float32) + b4_ref[...]

    o_ref[...] = h.astype(o_ref.dtype)


def _round_up(n, m):
    return ((n + m - 1) // m) * m


def _pick_batch_tile(B):
    """Pick the batch tile TB (multiple of 16 sublanes).

    Small B: single step covering the padded batch.
    Large B: TB in {512, 1024}, always leaving >=2 grid steps so v7x's two
    TensorCores are both fed via the 'parallel' grid dimension."""
    if B <= 512:
        return _round_up(max(B, 1), 16)
    return 1024 if B >= 2048 else 512


def pack_params(params):
    """One-time parameter packing (do NOT call per forward pass):
    pads the last layer to OUT_PAD lane-dense columns and casts weights to
    bf16; biases stay f32 for the f32 bias-add path."""
    w1, b1, w2, b2, w3, b3, w4, b4 = params
    pad_cols = OUT_PAD - w4.shape[1]
    w4p = jnp.pad(w4, ((0, 0), (0, pad_cols)))
    b4p = jnp.pad(b4, ((0, 0), (0, pad_cols)))
    return (w1.astype(jnp.bfloat16), b1.astype(jnp.float32),
            w2.astype(jnp.bfloat16), b2.astype(jnp.float32),
            w3.astype(jnp.bfloat16), b3.astype(jnp.float32),
            w4p.astype(jnp.bfloat16), b4p.astype(jnp.float32))


@jax.jit
def betas_predictor_padded(x, packed):
    """Hot path: single pallas_call. Returns the (Bp, OUT_PAD) f32 buffer;
    consumers that can index the first `output_dim` columns themselves should
    use this to avoid an extra HBM->HBM slice copy."""
    w1, b1, w2, b2, w3, b3, w4, b4 = packed
    B, in_dim = x.shape

    TB = _pick_batch_tile(B)
    Bp = _round_up(B, TB)
    xp = jnp.pad(x, ((0, Bp - B), (0, 0)))  # stays f32; cast happens in-kernel

    grid = (Bp // TB,)

    def const_spec(shape):
        # full-extent block, same index every grid step -> stays resident in VMEM
        return pl.BlockSpec(shape, lambda i: tuple(0 for _ in shape))

    in_specs = [
        pl.BlockSpec((TB, in_dim), lambda i: (i, 0)),   # x tile streams
        const_spec(w1.shape), const_spec(b1.shape),
        const_spec(w2.shape), const_spec(b2.shape),
        const_spec(w3.shape), const_spec(b3.shape),
        const_spec(w4.shape), const_spec(b4.shape),
    ]
    out_spec = pl.BlockSpec((TB, OUT_PAD), lambda i: (i, 0))

    flops = 2 * Bp * (in_dim * 64 + 64 * 128 + 128 * 256 + 256 * OUT_PAD)
    weight_bytes = sum(int(a.size) * a.dtype.itemsize
                       for a in (w1, b1, w2, b2, w3, b3, w4, b4))
    bytes_accessed = Bp * in_dim * 4 + Bp * OUT_PAD * 4 + weight_bytes

    return pl.pallas_call(
        _mlp_kernel,
        out_shape=jax.ShapeDtypeStruct((Bp, OUT_PAD), jnp.float32),
        grid=grid,
        in_specs=in_specs,
        out_specs=out_spec,
        compiler_params=pltpu.CompilerParams(
            dimension_semantics=("parallel",),   # shard batch grid across TCs (v7x)
            vmem_limit_bytes=32 * 1024 * 1024,   # safe on v7x's 64 MiB VMEM
        ),
        cost_estimate=pl.CostEstimate(
            flops=flops,
            transcendentals=Bp * 128 * 2,        # sigmoid ~ exp + reciprocal
            bytes_accessed=bytes_accessed,
        ),
    )(xp, w1, b1, w2, b2, w3, b3, w4, b4)


@functools.partial(jax.jit, static_argnames=("output_dim",))
def betas_predictor(x, packed, output_dim=100):
    """Convenience wrapper matching the PyTorch module API:
    returns (B, output_dim). The slice is fused into this jit."""
    out_padded = betas_predictor_padded(x, packed)
    return out_padded[:x.shape[0], :output_dim]


def init_params(key, input_dim=7, output_dim=100):
    """Deterministic init mimicking PyTorch nn.Linear default:
    U(-1/sqrt(fan_in), 1/sqrt(fan_in)) for both weight and bias.
    Weights are stored transposed: (in_features, out_features)."""
    dims = [input_dim, 64, 128, 256, output_dim]
    params = []
    for i in range(4):
        fan_in, fan_out = dims[i], dims[i + 1]
        key, kw, kb = jax.random.split(key, 3)
        bound = 1.0 / jnp.sqrt(float(fan_in))
        w = jax.random.uniform(kw, (fan_in, fan_out), jnp.float32, -bound, bound)
        b = jax.random.uniform(kb, (1, fan_out), jnp.float32, -bound, bound)
        params += [w, b]
    return tuple(params)


def reference_forward(x, params):
    w1, b1, w2, b2, w3, b3, w4, b4 = params
    h = jnp.maximum(x @ w1 + b1, 0.0)
    h = jax.nn.sigmoid(h @ w2 + b2)
    h = jnp.maximum(h @ w3 + b3, 0.0)
    return h @ w4 + b4


if __name__ == "__main__":
    key = jax.random.PRNGKey(0)
    k_x, k_p = jax.random.split(key)

    B, input_dim, output_dim = 8, 7, 100
    x = jax.random.normal(k_x, (B, input_dim), jnp.float32)
    params = init_params(k_p, input_dim=input_dim, output_dim=output_dim)

    # One-time packing (padding + bf16 casts) -- hoisted off the hot path.
    packed = pack_params(params)

    out = betas_predictor(x, packed, output_dim=output_dim)
    out = jax.block_until_ready(out)

    ref = reference_forward(x, params)
    assert out.shape == (B, output_dim), out.shape
    # bf16 matmul operands (f32 accumulate) -> loosened tolerance vs f32 reference
    assert jnp.allclose(out, ref, atol=5e-2, rtol=5e-2), "mismatch vs reference"

    print("KERNEL_OK")
</pallas_src>

<mosaic_0001>
module attributes {stable_mosaic.version = 11 : i64} {
  func.func @_mlp_kernel(%arg0: i32, %arg1: memref<16x7xf32, #tpu.memory_space<vmem>>, %arg2: memref<7x64xbf16, #tpu.memory_space<vmem>>, %arg3: memref<1x64xf32, #tpu.memory_space<vmem>>, %arg4: memref<64x128xbf16, #tpu.memory_space<vmem>>, %arg5: memref<1x128xf32, #tpu.memory_space<vmem>>, %arg6: memref<128x256xbf16, #tpu.memory_space<vmem>>, %arg7: memref<1x256xf32, #tpu.memory_space<vmem>>, %arg8: memref<256x128xbf16, #tpu.memory_space<vmem>>, %arg9: memref<1x128xf32, #tpu.memory_space<vmem>>, %arg10: memref<16x128xf32, #tpu.memory_space<vmem>>) attributes {dimension_semantics = [#tpu.dimension_semantics<parallel>], iteration_bounds = array<i64: 1>, scalar_prefetch = 0 : i64, scratch_operands = 0 : i64, tpu.core_type = #tpu.core_type<tc>, window_params = [{transform_indices = @transform_0, window_bounds = array<i64: 16, 7>}, {pipeline_mode = #tpu.pipeline_mode<synchronous>, transform_indices = @transform_1, window_bounds = array<i64: 7, 64>}, {pipeline_mode = #tpu.pipeline_mode<synchronous>, transform_indices = @transform_2, window_bounds = array<i64: 1, 64>}, {pipeline_mode = #tpu.pipeline_mode<synchronous>, transform_indices = @transform_3, window_bounds = array<i64: 64, 128>}, {pipeline_mode = #tpu.pipeline_mode<synchronous>, transform_indices = @transform_4, window_bounds = array<i64: 1, 128>}, {pipeline_mode = #tpu.pipeline_mode<synchronous>, transform_indices = @transform_5, window_bounds = array<i64: 128, 256>}, {pipeline_mode = #tpu.pipeline_mode<synchronous>, transform_indices = @transform_6, window_bounds = array<i64: 1, 256>}, {pipeline_mode = #tpu.pipeline_mode<synchronous>, transform_indices = @transform_7, window_bounds = array<i64: 256, 128>}, {pipeline_mode = #tpu.pipeline_mode<synchronous>, transform_indices = @transform_8, window_bounds = array<i64: 1, 128>}, {transform_indices = @transform_9, window_bounds = array<i64: 16, 128>}]} {
    %c0 = arith.constant 0 : index
    %c0_0 = arith.constant 0 : index
    %0 = vector.load %arg1[%c0, %c0_0] : memref<16x7xf32, #tpu.memory_space<vmem>>, vector<16x7xf32>
    %1 = arith.truncf %0 : vector<16x7xf32> to vector<16x7xbf16>
    %c0_1 = arith.constant 0 : index
    %c0_2 = arith.constant 0 : index
    %2 = vector.load %arg2[%c0_1, %c0_2] : memref<7x64xbf16, #tpu.memory_space<vmem>>, vector<7x64xbf16>
    %cst = arith.constant dense<0.000000e+00> : vector<16x64xf32>
    %3 = tpu.matmul %1, %2, %cst {dimension_numbers = #tpu.dot_dimension_numbers<[1], [0], [0], [1], [0, 0, 1, 1], [], []>} : vector<16x7xbf16>, vector<7x64xbf16>, vector<16x64xf32> -> vector<16x64xf32>
    %c0_3 = arith.constant 0 : index
    %c0_4 = arith.constant 0 : index
    %4 = vector.load %arg3[%c0_3, %c0_4] : memref<1x64xf32, #tpu.memory_space<vmem>>, vector<1x64xf32>
    %5 = vector.broadcast %4 : vector<1x64xf32> to vector<16x64xf32>
    %6 = arith.addf %3, %5 : vector<16x64xf32>
    %cst_5 = arith.constant 0.000000e+00 : f32
    %7 = vector.broadcast %cst_5 : f32 to vector<16x64xf32>
    %8 = arith.maximumf %6, %7 : vector<16x64xf32>
    %9 = arith.truncf %8 : vector<16x64xf32> to vector<16x64xbf16>
    %c0_6 = arith.constant 0 : index
    %c0_7 = arith.constant 0 : index
    %10 = vector.load %arg4[%c0_6, %c0_7] : memref<64x128xbf16, #tpu.memory_space<vmem>>, vector<64x128xbf16>
    %cst_8 = arith.constant dense<0.000000e+00> : vector<16x128xf32>
    %11 = tpu.matmul %9, %10, %cst_8 {dimension_numbers = #tpu.dot_dimension_numbers<[1], [0], [0], [1], [0, 0, 1, 1], [], []>} : vector<16x64xbf16>, vector<64x128xbf16>, vector<16x128xf32> -> vector<16x128xf32>
    %c0_9 = arith.constant 0 : index
    %c0_10 = arith.constant 0 : index
    %12 = vector.load %arg5[%c0_9, %c0_10] : memref<1x128xf32, #tpu.memory_space<vmem>>, vector<1x128xf32>
    %13 = vector.broadcast %12 : vector<1x128xf32> to vector<16x128xf32>
    %14 = arith.addf %11, %13 : vector<16x128xf32>
    %15 = arith.negf %14 : vector<16x128xf32>
    %16 = math.exp %15 : vector<16x128xf32>
    %cst_11 = arith.constant 1.000000e+00 : f32
    %17 = vector.broadcast %cst_11 : f32 to vector<16x128xf32>
    %18 = arith.addf %17, %16 : vector<16x128xf32>
    %19 = arith.divf %17, %18 : vector<16x128xf32>
    %20 = arith.truncf %19 : vector<16x128xf32> to vector<16x128xbf16>
    %c0_12 = arith.constant 0 : index
    %c0_13 = arith.constant 0 : index
    %21 = vector.load %arg6[%c0_12, %c0_13] : memref<128x256xbf16, #tpu.memory_space<vmem>>, vector<128x256xbf16>
    %cst_14 = arith.constant dense<0.000000e+00> : vector<16x256xf32>
    %22 = tpu.matmul %20, %21, %cst_14 {dimension_numbers = #tpu.dot_dimension_numbers<[1], [0], [0], [1], [0, 0, 1, 1], [], []>} : vector<16x128xbf16>, vector<128x256xbf16>, vector<16x256xf32> -> vector<16x256xf32>
    %c0_15 = arith.constant 0 : index
    %c0_16 = arith.constant 0 : index
    %23 = vector.load %arg7[%c0_15, %c0_16] : memref<1x256xf32, #tpu.memory_space<vmem>>, vector<1x256xf32>
    %24 = vector.broadcast %23 : vector<1x256xf32> to vector<16x256xf32>
    %25 = arith.addf %22, %24 : vector<16x256xf32>
    %cst_17 = arith.constant 0.000000e+00 : f32
    %26 = vector.broadcast %cst_17 : f32 to vector<16x256xf32>
    %27 = arith.maximumf %25, %26 : vector<16x256xf32>
    %28 = arith.truncf %27 : vector<16x256xf32> to vector<16x256xbf16>
    %c0_18 = arith.constant 0 : index
    %c0_19 = arith.constant 0 : index
    %29 = vector.load %arg8[%c0_18, %c0_19] : memref<256x128xbf16, #tpu.memory_space<vmem>>, vector<256x128xbf16>
    %cst_20 = arith.constant dense<0.000000e+00> : vector<16x128xf32>
    %30 = tpu.matmul %28, %29, %cst_20 {dimension_numbers = #tpu.dot_dimension_numbers<[1], [0], [0], [1], [0, 0, 1, 1], [], []>} : vector<16x256xbf16>, vector<256x128xbf16>, vector<16x128xf32> -> vector<16x128xf32>
    %c0_21 = arith.constant 0 : index
    %c0_22 = arith.constant 0 : index
    %31 = vector.load %arg9[%c0_21, %c0_22] : memref<1x128xf32, #tpu.memory_space<vmem>>, vector<1x128xf32>
    %32 = vector.broadcast %31 : vector<1x128xf32> to vector<16x128xf32>
    %33 = arith.addf %30, %32 : vector<16x128xf32>
    %c0_23 = arith.constant 0 : index
    %c0_24 = arith.constant 0 : index
    %34 = vector.load %arg10[%c0_23, %c0_24] : memref<16x128xf32, #tpu.memory_space<vmem>>, vector<16x128xf32>
    tpu.vector_store %arg10[%c0_23, %c0_24], %33 {strides = array<i32>} : memref<16x128xf32, #tpu.memory_space<vmem>>, vector<16x128xf32>,
    return
  }
  func.func @transform_0(%arg0: i32) -> (i32, i32) {
    %c0_i32 = arith.constant 0 : i32
    %c0_i32_0 = arith.constant 0 : i32
    return %arg0, %c0_i32 : i32, i32
  }
  func.func @transform_1(%arg0: i32) -> (i32, i32) {
    %c0_i32 = arith.constant 0 : i32
    %c0_i32_0 = arith.constant 0 : i32
    %c0_i32_1 = arith.constant 0 : i32
    return %c0_i32, %c0_i32_0 : i32, i32
  }
  func.func @transform_2(%arg0: i32) -> (i32, i32) {
    %c0_i32 = arith.constant 0 : i32
    %c0_i32_0 = arith.constant 0 : i32
    %c0_i32_1 = arith.constant 0 : i32
    return %c0_i32, %c0_i32_0 : i32, i32
  }
  func.func @transform_3(%arg0: i32) -> (i32, i32) {
    %c0_i32 = arith.constant 0 : i32
    %c0_i32_0 = arith.constant 0 : i32
    %c0_i32_1 = arith.constant 0 : i32
    return %c0_i32, %c0_i32_0 : i32, i32
  }
  func.func @transform_4(%arg0: i32) -> (i32, i32) {
    %c0_i32 = arith.constant 0 : i32
    %c0_i32_0 = arith.constant 0 : i32
    %c0_i32_1 = arith.constant 0 : i32
    return %c0_i32, %c0_i32_0 : i32, i32
  }
  func.func @transform_5(%arg0: i32) -> (i32, i32) {
    %c0_i32 = arith.constant 0 : i32
    %c0_i32_0 = arith.constant 0 : i32
    %c0_i32_1 = arith.constant 0 : i32
    return %c0_i32, %c0_i32_0 : i32, i32
  }
  func.func @transform_6(%arg0: i32) -> (i32, i32) {
    %c0_i32 = arith.constant 0 : i32
    %c0_i32_0 = arith.constant 0 : i32
    %c0_i32_1 = arith.constant 0 : i32
    return %c0_i32, %c0_i32_0 : i32, i32
  }
  func.func @transform_7(%arg0: i32) -> (i32, i32) {
    %c0_i32 = arith.constant 0 : i32
    %c0_i32_0 = arith.constant 0 : i32
    %c0_i32_1 = arith.constant 0 : i32
    return %c0_i32, %c0_i32_0 : i32, i32
  }
  func.func @transform_8(%arg0: i32) -> (i32, i32) {
    %c0_i32 = arith.constant 0 : i32
    %c0_i32_0 = arith.constant 0 : i32
    %c0_i32_1 = arith.constant 0 : i32
    return %c0_i32, %c0_i32_0 : i32, i32
  }
  func.func @transform_9(%arg0: i32) -> (i32, i32) {
    %c0_i32 = arith.constant 0 : i32
    %c0_i32_0 = arith.constant 0 : i32
    return %arg0, %c0_i32 : i32, i32
  }
}

</mosaic_0001>

<bundles_post_ra>
// kernel: betas_predictor_padded.1
= control target key start
LH: loop header
LB: loop body
LE: loop exit
PB: predicated region body
PF: predicated region fallthrough
CT: control target
= control target key end

     0   :  { %14 = vsyncpa [#allocation3], 0  ;;  %s983_s0 = inlined_call_operand.vmem [shape: f32[16,7], index: 0, kind: input, shape index: {}]   ;;  %s984_s1 = inlined_call_operand.vmem [shape: bf16[7,64], index: 1, kind: input, shape index: {}]   ;;  %s985_s2 = inlined_call_operand.hbm [shape: f32[1,64], index: 2, kind: input, shape index: {}]   ;;  %s986_s3 = inlined_call_operand.vmem [shape: bf16[64,128], index: 3, kind: input, shape index: {}]   ;;  %s987_s4 = inlined_call_operand.vmem [shape: f32[1,128], index: 4, kind: input, shape index: {}]   ;;  %s988_s5 = inlined_call_operand.hbm [shape: bf16[128,256], index: 5, kind: input, shape index: {}]   ;;  %s989_s6 = inlined_call_operand.vmem [shape: f32[1,256], index: 6, kind: input, shape index: {}]   ;;  %s990_s7 = inlined_call_operand.hbm [shape: bf16[256,128], index: 7, kind: input, shape index: {}]   ;;  %s991_s8 = inlined_call_operand.vmem [shape: f32[1,128], index: 8, kind: input, shape index: {}]   ;;  %s992_s9 = inlined_call_operand.hbm [shape: f32[16,128], index: 9, kind: output, shape index: {}]  }
   0x1   :  { %15 = vsyncpa [#allocation6], 0 }
   0x2   :  { %16 = vsyncpa [#allocation4], 0  ;;  %s837_s30 = smov [#allocation5]   ;;  %s743_s13 = scalar_lea.hbm %s988_s5, 2048 }
   0x3   :  { %s40_s10 = sshll.u32 %s837_s30, 4  ;;  %p744_p0 = scmp.ne.s32.totalorder %s988_s5, %s743_s13  ;;  %s41_s10 = int_to_ptr.vmem [resolvable:$true] %s40_s10 }
   0x4   :  { %p747_p1 = scmp.lt.u32.totalorder %s743_s13, %s988_s5 }
   0x6   :  { %p749_p2 = pnand %p747_p1, %p744_p0 }
   0x8   :  { %752 = shalt.err (!%p749_p2)
}
   0x9   :  { %s753_s18 = scalar_lea.vmem %s41_s10, 2048  ;;  %p758_p4 = scmp.lt.s32.totalorder %s41_s10, %s41_s10 }
   0xa   :  { %p754_p3 = scmp.ne.s32.totalorder %s41_s10, %s753_s18  ;;  %p759_p5 = scmp.lt.s32.totalorder %s753_s18, %s753_s18 }
   0xc   :  { %p760_p6 = por %p759_p5, %p758_p4 }
   0xe   :  { %p761_p7 = pnand %p760_p6, %p754_p3 }
  0x10   :  { %764 = shalt.err (!%p761_p7)
}
  0x11   :  { %s838_s19 = smov 128   ;;  %s839_s20 = smov 8  }
  0x12   :  { %46 = dma.hbm_to_vmem [thread:$0]  %s988_s5, 2048, %s41_s10, [#allocation6], %s838_s19, %s838_s19, %s839_s20  }
  0x13   :  { %s840_s23 = smov [#allocation2]   ;;  %s841_s25 = smov [#allocation7]  }
  0x14   :  { %s27_s24 = sshll.u32 %s840_s23, 4  ;;  %s54_s26 = sshll.u32 %s841_s25, 4  ;;  %s28_s24 = int_to_ptr.vmem [resolvable:$true] %s27_s24  ;;  %s55_s26 = int_to_ptr.vmem [resolvable:$true] %s54_s26 }
  0x15   :  { %s765_s29 = scalar_lea.hbm %s985_s2, 16 }
  0x16   :  { %p766_p8 = scmp.ne.s32.totalorder %s985_s2, %s765_s29  ;;  %p769_p9 = scmp.lt.u32.totalorder %s765_s29, %s985_s2 }
  0x18   :  { %p771_p10 = pnand %p769_p9, %p766_p8 }
  0x1a   :  { %774 = shalt.err (!%p771_p10)
}
  0x1b   :  { %s775_s5 = scalar_lea.vmem %s28_s24, 16  ;;  %s779_s10 = scalar_lea.vmem %s28_s24, 32 }
  0x1c   :  { %p776_p11 = scmp.ne.s32.totalorder %s28_s24, %s775_s5  ;;  %p780_p12 = scmp.lt.s32.totalorder %s28_s24, %s28_s24 }
  0x1d   :  { %p781_p13 = scmp.lt.s32.totalorder %s779_s10, %s775_s5 }
  0x1f   :  { %p782_p0 = por %p781_p13, %p780_p12 }
  0x21   :  { %p783_p1 = pnand %p782_p0, %p776_p11 }
  0x23   :  { %786 = shalt.err (!%p783_p1)
}
  0x24   :  { %30 = dma.hbm_to_vmem [thread:$0]  %s985_s2, 16, %s28_s24, [#allocation3]  }
  0x25   :  { %s787_s18 = scalar_lea.hbm %s990_s7, 2048 }
  0x26   :  { %p788_p2 = scmp.ne.s32.totalorder %s990_s7, %s787_s18  ;;  %p791_p3 = scmp.lt.u32.totalorder %s787_s18, %s990_s7 }
  0x28   :  { %p793_p4 = pnand %p791_p3, %p788_p2 }
  0x2a   :  { %796 = shalt.err (!%p793_p4)
}
  0x2b   :  { %s797_s27 = scalar_lea.vmem %s55_s26, 2048  ;;  %p802_p6 = scmp.lt.s32.totalorder %s55_s26, %s55_s26 }
  0x2c   :  { %p798_p5 = scmp.ne.s32.totalorder %s55_s26, %s797_s27  ;;  %p803_p7 = scmp.lt.s32.totalorder %s797_s27, %s797_s27 }
  0x2e   :  { %p804_p8 = por %p803_p7, %p802_p6 }
  0x30   :  { %p805_p9 = pnand %p804_p8, %p798_p5 }
  0x32   :  { %808 = shalt.err (!%p805_p9)
}
  0x33   :  { %s842_s2 = smov 64   ;;  %s843_s24 = smov 4  }
  0x34   :  { %60 = dma.hbm_to_vmem [thread:$0]  %s990_s7, 2048, %s55_s26, [#allocation6], %s842_s2, %s842_s2, %s843_s24  }
  0x35   :  { %831 = dma.done.wait [#allocation3], 16  }
  0x36   :  { %832 = vsyncadd [#allocation3], 4294967280 }
  0x37   :  { %833 = dma.done.wait [#allocation6], 4096  }
  0x38   :  { %834 = vsyncadd [#allocation6], 4294963200  ;;  %vm88_vm0 = vcmask 1042432   ;;  %v844_v0 = vmov 0.0   ;;  %vm89_vm1 = vcmask 1043456   ;;  %v845_v1 = vmov 65535  }
  0x39   :  { %661 = vmatprep.subr.bf16.mxu0 %v844_v0  ;;  %667 = vmatprep.subr.bf16.mxu1 %v844_v0  ;;  %v90_v2 = vsel %vm88_vm0, 4294967295, %v845_v1  ;;  %vm846_vm2 = vmmov 0   ;;  %v76_v4 = vld [vmem:[%s984_s1] sm:$0xf]  ;;  %v74_v6 = vld [vmem:[%s983_s0 + $0x8] sm:$0xff]  ;;  %vm84_vm3 = vcmask 56320  }
  0x3a   :  { %663 = vmatprep.mubr.msk.bf16.mxu0 %vm846_vm2, %v844_v0  ;;  %675 = vmatprep.mubr.msk.bf16.mxu1 %vm846_vm2, %v844_v0  ;;  %v91_v3 = vsel %vm89_vm1, %v90_v2, 0  ;;  %v73_v5 = vld [vmem:[%s983_s0] sm:$0xff]  ;;  %v692_v10 = vld [vmem:[%s986_s3 + $0x8] sm:$0xff]   ;;  %v693_v11 = vld [vmem:[%s986_s3 + $0x10] sm:$0xff]   ;;  %vm178_vm4 = vcmask 523264   ;;  %v847_v37 = vmov 0  }
  0x3b   :  { %v93_v7 = vand.u32 %v91_v3, %v76_v4  ;;  %v691_v8 = vld [vmem:[%s986_s3] sm:$0xff]   ;;  %v75_v9 = vpack.c.bf16 %v74_v6, %v73_v5  ;;  %v694_v12 = vld [vmem:[%s986_s3 + $0x18] sm:$0xff]   ;;  %v589_v13 = vld [vmem:[#allocation2] ss:$0 sm:$0xff]  ;;  %s848_s23 = smov [#allocation8]  }
  0x3c   :  { %668 = vmatpush3.bf16.msra.mxu1 %v691_v8  ;;  %v697_v23 = vld [vmem:[#allocation5 + $0x4] ss:$8 sps:$4 sm:$0xff]   ;;  %v695_v24 = vld [vmem:[#allocation5] ss:$8 sps:$4 sm:$0xff]   ;;  %v700_v25 = vld [vmem:[#allocation5 + $0x14] ss:$8 sps:$4 sm:$0xff]   ;;  %v254_v8 = vlaneseq }
  0x3d   :  { %662 = vmatpush3.bf16.msra.mxu0 %v93_v7  ;;  %669 = vmatprep.subr.bf16.mxu1 %v844_v0  ;;  %v698_v26 = vld [vmem:[#allocation5 + $0x10] ss:$8 sps:$4 sm:$0xff]   ;;  %v703_v27 = vld [vmem:[#allocation5 + $0x24] ss:$8 sps:$4 sm:$0xff]   ;;  %v701_v28 = vld [vmem:[#allocation5 + $0x20] ss:$8 sps:$4 sm:$0xff]  }
  0x3e   :  { %344 = vmatprep.subr.bf16.mxu0 %v697_v23  ;;  %v706_v29 = vld [vmem:[#allocation5 + $0x34] ss:$8 sps:$4 sm:$0xff]   ;;  %v704_v30 = vld [vmem:[#allocation5 + $0x30] ss:$8 sps:$4 sm:$0xff]   ;;  %v709_v31 = vld [vmem:[#allocation5 + $0x44] ss:$8 sps:$4 sm:$0xff]  }
  0x3f   :  { %v707_v32 = vld [vmem:[#allocation5 + $0x40] ss:$8 sps:$4 sm:$0xff]   ;;  %v712_v33 = vld [vmem:[#allocation5 + $0x54] ss:$8 sps:$4 sm:$0xff]   ;;  %v710_v34 = vld [vmem:[#allocation5 + $0x50] ss:$8 sps:$4 sm:$0xff]  }
  0x40   :  { %664 = vmatmul.mubr.msk.bf16.vlgmr.msra.gmra.mrb[0].mxu0 %vm84_vm3, %v75_v9  ;;  %670 = vmatpush3.bf16.msra.mxu1 %v692_v10  ;;  %v715_v35 = vld [vmem:[#allocation5 + $0x64] ss:$8 sps:$4 sm:$0xff]   ;;  %v713_v36 = vld [vmem:[#allocation5 + $0x60] ss:$8 sps:$4 sm:$0xff]   ;;  %v718_v38 = vld [vmem:[#allocation5 + $0x74] ss:$8 sps:$4 sm:$0xff]  }
  0x41   :  { %671 = vmatprep.subr.bf16.mxu1 %v844_v0  ;;  %345 = vmatpush1.bf16.msra.mxu0 %v695_v24  ;;  %v716_v39 = vld [vmem:[#allocation5 + $0x70] ss:$8 sps:$4 sm:$0xff]   ;;  %v719_v40 = vld [vmem:[#allocation7 + $0x40] sm:$0xff]   ;;  %v721_v42 = vld [vmem:[#allocation7 + $0x48] sm:$0xff]   ;;  %v255_v9 = vshrl.u32 %v254_v8, 7  ;;  %s576_s25 = sshll.u32 %s848_s23, 4  ;;  %s577_s25 = int_to_ptr.vmem [resolvable:$true] %s576_s25 }
  0x42   :  { %346 = vmatprep.subr.bf16.mxu0 %v700_v25  ;;  %376 = vmatprep.mubr.bf16.mxu0 %v847_v37  ;;  %v720_v41 = vld [vmem:[#allocation7] sm:$0xff]   ;;  %v722_v43 = vld [vmem:[#allocation7 + $0x8] sm:$0xff]   ;;  %v723_v44 = vld [vmem:[#allocation7 + $0x50] sm:$0xff]   ;;  %s809_s27 = scalar_lea.vmem %s577_s25, 256  ;;  %p814_p11 = scmp.lt.s32.totalorder %s577_s25, %s577_s25 }
  0x43   :  { %v724_v45 = vld [vmem:[#allocation7 + $0x10] sm:$0xff]   ;;  %v725_v46 = vld [vmem:[#allocation7 + $0x58] sm:$0xff]   ;;  %v727_v48 = vld [vmem:[#allocation7 + $0x60] sm:$0xff]   ;;  %v256_v10 = vsub.s32 0, %v255_v9  ;;  %p810_p10 = scmp.ne.s32.totalorder %s577_s25, %s809_s27  ;;  %p815_p12 = scmp.lt.s32.totalorder %s809_s27, %s809_s27 }
  0x44   :  { %672 = vmatpush3.bf16.msra.mxu1 %v693_v11  ;;  %v726_v47 = vld [vmem:[#allocation7 + $0x18] sm:$0xff]   ;;  %v728_v49 = vld [vmem:[#allocation7 + $0x20] sm:$0xff]   ;;  %v729_v50 = vld [vmem:[#allocation7 + $0x68] sm:$0xff]  }
  0x45   :  { %673 = vmatprep.subr.bf16.mxu1 %v844_v0  ;;  %347 = vmatpush1.bf16.msra.mxu0 %v698_v26  ;;  %v591_v51 = vld [vmem:[%s987_s4] ss:$0 sm:$0xff]  ;;  %v731_v4 = vld [vmem:[#allocation7 + $0x70] sm:$0xff]   ;;  %v733_v6 = vld [vmem:[#allocation7 + $0x78] sm:$0xff]   ;;  %p816_p13 = por %p815_p12, %p814_p11 }
  0x46   :  { %348 = vmatprep.subr.bf16.mxu0 %v703_v27  ;;  %v730_v3 = vld [vmem:[#allocation7 + $0x28] sm:$0xff]   ;;  %v732_v5 = vld [vmem:[#allocation7 + $0x30] sm:$0xff]   ;;  %v734_v7 = vld [vmem:[#allocation7 + $0x38] sm:$0xff]  }
  0x47   :  { %v252_v11 = vld [vmem:[%s989_s6] sm:$0x3]  ;;  %p817_p0 = pnand %p816_p13, %p810_p10 }
  0x48   :  { %674 = vmatpush3.bf16.msra.mxu1 %v694_v12  ;;  %v260_v12 = vsub.s32 1, %v255_v9 }
  0x49   :  { %349 = vmatpush1.bf16.msra.mxu0 %v701_v28  ;;  %639 = vmatprep.subr.bf16.mxu1 %v719_v40 }
  0x4a   :  { %350 = vmatprep.subr.bf16.mxu0 %v706_v29 }
  0x4d   :  { %351 = vmatpush1.bf16.msra.mxu0 %v704_v30  ;;  %v615_v30 = vld [vmem:[%s991_s8] ss:$0 sm:$0xff] }
  0x4e   :  { %352 = vmatprep.subr.bf16.mxu0 %v709_v31 }
  0x51   :  { %353 = vmatpush1.bf16.msra.mxu0 %v707_v32 }
  0x52   :  { %354 = vmatprep.subr.bf16.mxu0 %v712_v33 }
  0x55   :  { %355 = vmatpush1.bf16.msra.mxu0 %v710_v34 }
  0x56   :  { %356 = vmatprep.subr.bf16.mxu0 %v715_v35 }
  0x59   :  { %357 = vmatpush1.bf16.msra.mxu0 %v713_v36 }
  0x5a   :  { %358 = vmatprep.subr.bf16.mxu0 %v718_v38 }
  0x5d   :  { %359 = vmatpush1.bf16.msra.mxu0 %v716_v39 }
 0x113   :  { %v129_v14 = vpop.f32.mrb[0].mxu0 }
 0x114   :  { %v130_v15 = vadd.f32 %v589_v13, %v129_v14  ;;  %v665_v16 = vpop.f32.mrb[1].mxu0  ;;  %v261_v14 = vrot.slane %v252_v11, %v260_v12 }
 0x115   :  { %v132_v17 = vpop.f32.mrb[2].mxu0 }
 0x116   :  { %v133_v18 = vadd.f32 %v589_v13, %v132_v17  ;;  %v666_v19 = vpop.f32.mrb[3].mxu0  ;;  %v136_v20 = vmax.f32 %v130_v15, 0.0  ;;  %v257_v13 = vrot.slane %v252_v11, %v256_v10 }
 0x118   :  { %v137_v21 = vmax.f32 %v133_v18, 0.0 }
 0x11a   :  { %v138_v22 = vpack.c.bf16 %v137_v21, %v136_v20 }
 0x11c   :  { %676 = vmatmul.mubr.msk.bf16.vlgmr.msra.gmra.mrb[0].mxu1 %vm178_vm4, %v138_v22 }
 0x11d   :  { %640 = vmatpush3.bf16.msra.mxu1 %v720_v41 }
 0x11e   :  { %641 = vmatprep.subr.bf16.mxu1 %v721_v42 }
 0x121   :  { %642 = vmatpush3.bf16.msra.mxu1 %v722_v43 }
 0x122   :  { %643 = vmatprep.subr.bf16.mxu1 %v723_v44 }
 0x125   :  { %644 = vmatpush3.bf16.msra.mxu1 %v724_v45 }
 0x126   :  { %645 = vmatprep.subr.bf16.mxu1 %v725_v46 }
 0x129   :  { %646 = vmatpush3.bf16.msra.mxu1 %v726_v47 }
 0x12a   :  { %647 = vmatprep.subr.bf16.mxu1 %v727_v48 }
 0x12d   :  { %648 = vmatpush3.bf16.msra.mxu1 %v728_v49 }
 0x12e   :  { %649 = vmatprep.subr.bf16.mxu1 %v729_v50 }
 0x131   :  { %650 = vmatpush3.bf16.msra.mxu1 %v730_v3 }
 0x132   :  { %651 = vmatprep.subr.bf16.mxu1 %v731_v4 }
 0x135   :  { %652 = vmatpush3.bf16.msra.mxu1 %v732_v5 }
 0x136   :  { %653 = vmatprep.subr.bf16.mxu1 %v733_v6 }
 0x139   :  { %654 = vmatpush3.bf16.msra.mxu1 %v734_v7 }
 0x1ef   :  { %v216_v52 = vpop.f32.mrb[0].mxu1 }
 0x1f0   :  { %v217_v53 = vadd.f32 %v591_v51, %v216_v52  ;;  %v677_v54 = vpop.f32.mrb[1].mxu1 }
 0x1f1   :  { %v219_v55 = vpop.f32.mrb[2].mxu1 }
 0x1f2   :  { %v597_v56 = vmul.f32 -1.442695, %v217_v53  ;;  %v220_v57 = vadd.f32 %v591_v51, %v219_v55  ;;  %v678_v58 = vpop.f32.mrb[3].mxu1 }
 0x1f4   :  { %735 = vpow2.f32 %v597_v56  ;;  %v598_v59 = vmul.f32 -1.442695, %v220_v57 }
 0x1f6   :  { %737 = vpow2.f32 %v598_v59 }
 0x1fe   :  { %v736_v60 = vpop.eup %735 }
 0x1ff   :  { %v229_v61 = vadd.f32 1.0, %v736_v60 }
 0x200   :  { %v738_v62 = vpop.eup %737 }
 0x201   :  { %v230_v63 = vadd.f32 1.0, %v738_v62  ;;  %739 = vrcp.f32 %v229_v61 }
 0x203   :  { %741 = vrcp.f32 %v230_v63 }
 0x20b   :  { %v740_v0 = vpop.eup %739 }
 0x20d   :  { %v742_v1 = vpop.eup %741 }
 0x20e   :  { %v235_v2 = vpack.c.bf16 %v742_v1, %v740_v0 }
 0x210   :  { %377 = vmatmul.mubr.bf16.vlgmr.msra.gmra.mrb[4].mxu0 %v235_v2 }
 0x2e3   :  { %v378_v15 = vpop.f32.mrb[4].mxu0 }
 0x2e4   :  { %v379_v16 = vadd.f32 %v378_v15, %v257_v13  ;;  %v380_v17 = vpop.f32.mrb[5].mxu0 }
 0x2e5   :  { %v381_v18 = vadd.f32 %v380_v17, %v261_v14  ;;  %v382_v19 = vpop.f32.mrb[6].mxu0 }
 0x2e6   :  { %v383_v20 = vadd.f32 %v382_v19, %v257_v13  ;;  %v384_v21 = vpop.f32.mrb[7].mxu0  ;;  %v387_v23 = vmax.f32 %v379_v16, 0.0 }
 0x2e7   :  { %v385_v22 = vadd.f32 %v384_v21, %v261_v14  ;;  %v388_v25 = vmax.f32 %v381_v18, 0.0 }
 0x2e8   :  { %v389_v24 = vmax.f32 %v383_v20, 0.0 }
 0x2e9   :  { %v390_v26 = vmax.f32 %v385_v22, 0.0 }
 0x2ea   :  { %v391_v27 = vpack.c.bf16 %v389_v24, %v387_v23 }
 0x2eb   :  { %v392_v28 = vpack.c.bf16 %v390_v26, %v388_v25 }
 0x2ed   :  { %560 = vmatprep.mubr.bf16.mxu1 %v392_v28 }
 0x2ee   :  { %561 = vmatmul.mubr.bf16.vlgmr.msra.gmra.mrb[4].mxu1 %v391_v27 }
 0x3c1   :  { %v655_v29 = vpop.f32.mrb[4].mxu1 }
 0x3c2   :  { %v656_v31 = vpop.f32.mrb[5].mxu1 }
 0x3c3   :  { %v657_v32 = vadd.f32 %v656_v31, %v655_v29  ;;  %v658_v33 = vpop.f32.mrb[6].mxu1 }
 0x3c4   :  { %v659_v34 = vpop.f32.mrb[7].mxu1 }
 0x3c5   :  { %v563_v35 = vadd.f32 %v657_v32, %v615_v30  ;;  %v660_v36 = vadd.f32 %v659_v34, %v658_v33 }
 0x3c7   :  { %569 = vst [vmem:[#allocation8] sm:$0xff] %v563_v35  ;;  %v566_v37 = vadd.f32 %v660_v36, %v615_v30 }
 0x3c9   :  { %570 = vst [vmem:[#allocation8 + $0x8] sm:$0xff] %v566_v37 }
 0x3ca   :  { %820 = shalt.err (!%p817_p0)
}
 0x3cb   :  { %s821_s24 = scalar_lea.hbm %s992_s9, 256 }
 0x3cc   :  { %p822_p1 = scmp.ne.s32.totalorder %s992_s9, %s821_s24  ;;  %p825_p2 = scmp.lt.u32.totalorder %s821_s24, %s992_s9 }
 0x3ce   :  { %p827_p3 = pnand %p825_p2, %p822_p1 }
 0x3d0   :  { %830 = shalt.err (!%p827_p3)
}
 0x3d1   :  { %582 = dma.vmem_to_hbm [thread:$0]  %s577_s25, 256, %s992_s9, [#allocation4], %s838_s19, %s838_s19, %s839_s20  }
 0x3d2   :  { %835 = dma.done.wait [#allocation4], 256  }
 0x3d3   :  { %836 = vsyncadd [#allocation4], 4294967040 }
 0x3d4   :  { %586 = vsyncpa [#allocation3], 1 }
 0x3d5   :  { %587 = vsyncpa [#allocation6], 1 }
 0x3d6   :  { %588 = vsyncpa [#allocation4], 1 }

</bundles_post_ra>
